<compile_context>
chip_gen: v7x
topology: tpu7x:2x2x1
jax: 0.10.0
libtpu: 0.0.40
codegen_flags: <defaults>
</compile_context>

<pallas_src>
import functools

import jax
import jax.numpy as jnp
from jax.experimental import pallas as pl
from jax.experimental.pallas import tpu as pltpu


def _downsample_kernel(p_ref, w_ref, b_ref, g_ref, beta_ref, o_ref, *, eps, cout):
    # p_ref:    (tile_m, Kdim)  bf16 patchified input rows.  On the ragged last
    #                           block, out-of-range rows hold garbage; rows are
    #                           independent and their stores are masked, so this
    #                           is safe (do NOT add tile-wide reductions here).
    # w_ref:    (Kdim, Cout)    bf16 reshaped conv weight
    # b_ref:    (1, Cout)       f32 conv bias
    # g_ref:    (1, Cout)       f32 LayerNorm gamma
    # beta_ref: (1, Cout)       f32 LayerNorm beta
    # o_ref:    (tile_m, Cout)  output (true channel width, no lane padding)
    y = jnp.dot(p_ref[...], w_ref[...], preferred_element_type=jnp.float32)
    y = y + b_ref[...]

    # Channel LayerNorm over the true Cout channels (two-pass moments, exactly
    # like the PyTorch module).
    inv_c = 1.0 / float(cout)
    mu = jnp.sum(y, axis=-1, keepdims=True) * inv_c
    d = y - mu
    var = jnp.sum(d * d, axis=-1, keepdims=True) * inv_c
    xn = d * jax.lax.rsqrt(var + eps)          # rsqrt -> EUP slot (free-ish)

    o_ref[...] = (g_ref[...] * xn + beta_ref[...]).astype(o_ref.dtype)


def _vmem_limit_bytes():
    """Scoped-VMEM limit: most of physical capacity (v5e/v6e 128 MiB, v7x 64 MiB)."""
    try:
        cap = int(pltpu.get_tpu_info().vmem_capacity_bytes)
    except Exception:
        cap = 64 << 20          # conservative fallback (v7x per-core capacity)
    return int(min(int(cap * 0.75), 96 << 20))


def _pick_tile_m(requested, M, Kdim, Cout, vmem_limit, in_bytes, out_bytes):
    """Largest row tile that fits the VMEM budget, with honest accounting."""
    budget = vmem_limit // 2                           # headroom for Mosaic internals
    # Constants (weight + bias/gamma/beta) are double-buffered by the pipeline.
    resident = 2 * (Kdim * Cout * in_bytes + 3 * Cout * 4)
    # Per output row: double-buffered input block + double-buffered output
    # block + f32 intermediates (y, y-mu, normalized) that live in VMEM.
    per_row = 2 * Kdim * in_bytes + 2 * Cout * out_bytes + 3 * Cout * 4
    cap = max(8, (budget - resident) // max(per_row, 1))
    tm = max(8, min(int(requested), int(cap)))
    if tm >= M:
        return int(M)                                  # single full-extent block
    tm = max(8, (tm // 8) * 8)                         # sublane alignment
    if tm > 128:
        tm = (tm // 128) * 128                         # MXU-friendly when large
    return int(tm)


def downsampling_forward(x, conv_w, conv_b, ln_w, ln_b, *, down_scale=4,
                         eps=1e-6, tile_m=1024, matmul_dtype=jnp.bfloat16,
                         out_dtype=None):
    """x: (N, Cin, H, W) NCHW.  Returns (N, Cout, H//ds, W//ds) NCHW."""
    N, Cin, H, W = x.shape
    Cout = conv_w.shape[0]
    K = down_scale
    assert H % K == 0 and W % K == 0
    Ho, Wo = H // K, W // K
    out_dtype = x.dtype if out_dtype is None else out_dtype

    M = N * Ho * Wo
    Kdim = Cin * K * K

    # --- wrapper glue: cast first, then patchify (XLA fuses into one pass:
    # f32 read, bf16 patchified write).  Column ordering is (c, kh, kw).
    # TODO(synk): with an NHWC input contract this pass disappears entirely.
    xl = x.astype(matmul_dtype)
    patches = xl.reshape(N, Cin, Ho, K, Wo, K).transpose(0, 2, 4, 1, 3, 5)
    patches = patches.reshape(M, Kdim)

    # conv weight (Cout,Cin,K,K) -> (Kdim, Cout); params as (1, Cout) rows.
    # True channel width everywhere: no HBM padding of the (large) output,
    # and no Kdim padding of the (dominant) input read.
    w_mat = conv_w.reshape(Cout, Kdim).T.astype(matmul_dtype)
    b_row = conv_b.astype(jnp.float32).reshape(1, Cout)
    g_row = ln_w.astype(jnp.float32).reshape(1, Cout)
    beta_row = ln_b.astype(jnp.float32).reshape(1, Cout)

    vmem_limit = _vmem_limit_bytes()
    in_bytes = jnp.dtype(matmul_dtype).itemsize
    out_bytes = jnp.dtype(out_dtype).itemsize
    tm = _pick_tile_m(tile_m, M, Kdim, Cout, vmem_limit, in_bytes, out_bytes)

    kernel = functools.partial(_downsample_kernel, eps=eps, cout=Cout)
    out = pl.pallas_call(
        kernel,
        out_shape=jax.ShapeDtypeStruct((M, Cout), out_dtype),
        grid_spec=pltpu.PrefetchScalarGridSpec(
            num_scalar_prefetch=0,
            grid=(pl.cdiv(M, tm),),          # ragged last block; no row-pad copy
            in_specs=[
                pl.BlockSpec((tm, Kdim), lambda i: (i, 0)),
                # TODO(synk): once profiling shows exposed DMA, pin the four
                # constants with pipeline_mode=pl.Buffered(1) and raise the
                # patches input to pl.Buffered(3) on v6e; kept defaults here
                # for maximum lowering portability.
                pl.BlockSpec((Kdim, Cout), lambda i: (0, 0)),
                pl.BlockSpec((1, Cout), lambda i: (0, 0)),
                pl.BlockSpec((1, Cout), lambda i: (0, 0)),
                pl.BlockSpec((1, Cout), lambda i: (0, 0)),
            ],
            out_specs=pl.BlockSpec((tm, Cout), lambda i: (i, 0)),
        ),
        compiler_params=pltpu.CompilerParams(
            # TODO(synk): on v7x switch to pltpu.CORE_PARALLEL if "parallel"
            # alone does not split the row axis across the two TensorCores.
            dimension_semantics=("parallel",),
            vmem_limit_bytes=vmem_limit),
    )(patches, w_mat, b_row, g_row, beta_row)

    # Free reshape; one transpose back to the module's NCHW output layout.
    # TODO(synk): emit NHWC (and/or bf16) directly if downstream consumes it.
    return out.reshape(N, Ho, Wo, Cout).transpose(0, 3, 1, 2)


def _reference(x, conv_w, conv_b, ln_w, ln_b, *, down_scale=4, eps=1e-6,
               matmul_dtype=jnp.bfloat16):
    """Pure-JAX reference matching the module; conv operands quantized to the
    same matmul dtype as the kernel (f32 accumulation + f32 LN math), so the
    comparison is precision-for-precision."""
    y = jax.lax.conv_general_dilated(
        x.astype(matmul_dtype), conv_w.astype(matmul_dtype),
        window_strides=(down_scale, down_scale), padding="VALID",
        dimension_numbers=("NCHW", "OIHW", "NCHW"),
        preferred_element_type=jnp.float32)
    y = y + conv_b.astype(jnp.float32)[None, :, None, None]
    u = jnp.mean(y, axis=1, keepdims=True)
    s = jnp.mean((y - u) ** 2, axis=1, keepdims=True)
    yn = (y - u) / jnp.sqrt(s + eps)
    return (ln_w.astype(jnp.float32)[None, :, None, None] * yn
            + ln_b.astype(jnp.float32)[None, :, None, None])


if __name__ == "__main__":
    # Module defaults: dim_in=3, dim_out=2, down_scale=4, norm_first=False
    dim_in, dim_out, down_scale = 3, 2, 4
    N, H, W = 2, 16, 16

    key = jax.random.PRNGKey(0)
    kx, kw, kb = jax.random.split(key, 3)
    x = jax.random.normal(kx, (N, dim_in, H, W), dtype=jnp.float32)

    # deterministic synthetic parameters (Conv2d weight/bias; LayerNorm ones/zeros)
    fan_in = dim_in * down_scale * down_scale
    conv_w = jax.random.normal(kw, (dim_out, dim_in, down_scale, down_scale),
                               dtype=jnp.float32) / jnp.sqrt(float(fan_in))
    conv_b = 0.1 * jax.random.normal(kb, (dim_out,), dtype=jnp.float32)
    ln_w = jnp.ones((dim_out,), dtype=jnp.float32)
    ln_b = jnp.zeros((dim_out,), dtype=jnp.float32)

    out = downsampling_forward(x, conv_w, conv_b, ln_w, ln_b,
                               down_scale=down_scale)
    out = jax.block_until_ready(out)

    ref = _reference(x, conv_w, conv_b, ln_w, ln_b, down_scale=down_scale)
    assert out.shape == (N, dim_out, H // down_scale, W // down_scale), out.shape
    assert jnp.allclose(out, ref, atol=1e-2, rtol=1e-2), float(
        jnp.max(jnp.abs(out - ref)))

    print("KERNEL_OK")
</pallas_src>

<mosaic_0001>
module attributes {stable_mosaic.version = 11 : i64} {
  func.func @_downsample_kernel(%arg0: i32, %arg1: memref<32x48xbf16, #tpu.memory_space<vmem>>, %arg2: memref<48x2xbf16, #tpu.memory_space<vmem>>, %arg3: memref<1x2xf32, #tpu.memory_space<vmem>>, %arg4: memref<1x2xf32, #tpu.memory_space<vmem>>, %arg5: memref<1x2xf32, #tpu.memory_space<vmem>>, %arg6: memref<32x2xf32, #tpu.memory_space<vmem>>) attributes {dimension_semantics = [#tpu.dimension_semantics<parallel>], iteration_bounds = array<i64: 1>, scalar_prefetch = 0 : i64, scratch_operands = 0 : i64, tpu.core_type = #tpu.core_type<tc>, window_params = [{transform_indices = @transform_0, window_bounds = array<i64: 32, 48>}, {pipeline_mode = #tpu.pipeline_mode<synchronous>, transform_indices = @transform_1, window_bounds = array<i64: 48, 2>}, {pipeline_mode = #tpu.pipeline_mode<synchronous>, transform_indices = @transform_2, window_bounds = array<i64: 1, 2>}, {pipeline_mode = #tpu.pipeline_mode<synchronous>, transform_indices = @transform_3, window_bounds = array<i64: 1, 2>}, {pipeline_mode = #tpu.pipeline_mode<synchronous>, transform_indices = @transform_4, window_bounds = array<i64: 1, 2>}, {transform_indices = @transform_5, window_bounds = array<i64: 32, 2>}]} {
    %c0 = arith.constant 0 : index
    %c0_0 = arith.constant 0 : index
    %0 = vector.load %arg1[%c0, %c0_0] : memref<32x48xbf16, #tpu.memory_space<vmem>>, vector<32x48xbf16>
    %c0_1 = arith.constant 0 : index
    %c0_2 = arith.constant 0 : index
    %1 = vector.load %arg2[%c0_1, %c0_2] : memref<48x2xbf16, #tpu.memory_space<vmem>>, vector<48x2xbf16>
    %cst = arith.constant dense<0.000000e+00> : vector<32x2xf32>
    %2 = tpu.matmul %0, %1, %cst {dimension_numbers = #tpu.dot_dimension_numbers<[1], [0], [0], [1], [0, 0, 1, 1], [], []>} : vector<32x48xbf16>, vector<48x2xbf16>, vector<32x2xf32> -> vector<32x2xf32>
    %c0_3 = arith.constant 0 : index
    %c0_4 = arith.constant 0 : index
    %3 = vector.load %arg3[%c0_3, %c0_4] : memref<1x2xf32, #tpu.memory_space<vmem>>, vector<1x2xf32>
    %4 = vector.broadcast %3 : vector<1x2xf32> to vector<32x2xf32>
    %5 = arith.addf %2, %4 : vector<32x2xf32>
    %cst_5 = arith.constant dense<0.000000e+00> : vector<32xf32>
    %6 = vector.multi_reduction <add>, %5, %cst_5 [1] : vector<32x2xf32> to vector<32xf32>
    %7 = vector.shape_cast %6 : vector<32xf32> to vector<32x1xf32>
    %cst_6 = arith.constant 5.000000e-01 : f32
    %8 = vector.broadcast %cst_6 : f32 to vector<32x1xf32>
    %9 = arith.mulf %7, %8 : vector<32x1xf32>
    %10 = vector.broadcast %9 : vector<32x1xf32> to vector<32x2xf32>
    %11 = arith.subf %5, %10 : vector<32x2xf32>
    %12 = arith.mulf %11, %11 : vector<32x2xf32>
    %cst_7 = arith.constant dense<0.000000e+00> : vector<32xf32>
    %13 = vector.multi_reduction <add>, %12, %cst_7 [1] : vector<32x2xf32> to vector<32xf32>
    %14 = vector.shape_cast %13 : vector<32xf32> to vector<32x1xf32>
    %cst_8 = arith.constant 5.000000e-01 : f32
    %15 = vector.broadcast %cst_8 : f32 to vector<32x1xf32>
    %16 = arith.mulf %14, %15 : vector<32x1xf32>
    %cst_9 = arith.constant 9.99999997E-7 : f32
    %17 = vector.broadcast %cst_9 : f32 to vector<32x1xf32>
    %18 = arith.addf %16, %17 : vector<32x1xf32>
    %19 = math.rsqrt %18 : vector<32x1xf32>
    %20 = vector.broadcast %19 : vector<32x1xf32> to vector<32x2xf32>
    %21 = arith.mulf %11, %20 : vector<32x2xf32>
    %c0_10 = arith.constant 0 : index
    %c0_11 = arith.constant 0 : index
    %22 = vector.load %arg4[%c0_10, %c0_11] : memref<1x2xf32, #tpu.memory_space<vmem>>, vector<1x2xf32>
    %23 = vector.broadcast %22 : vector<1x2xf32> to vector<32x2xf32>
    %24 = arith.mulf %23, %21 : vector<32x2xf32>
    %c0_12 = arith.constant 0 : index
    %c0_13 = arith.constant 0 : index
    %25 = vector.load %arg5[%c0_12, %c0_13] : memref<1x2xf32, #tpu.memory_space<vmem>>, vector<1x2xf32>
    %26 = vector.broadcast %25 : vector<1x2xf32> to vector<32x2xf32>
    %27 = arith.addf %24, %26 : vector<32x2xf32>
    %c0_14 = arith.constant 0 : index
    %c0_15 = arith.constant 0 : index
    %28 = vector.load %arg6[%c0_14, %c0_15] : memref<32x2xf32, #tpu.memory_space<vmem>>, vector<32x2xf32>
    tpu.vector_store %arg6[%c0_14, %c0_15], %27 {strides = array<i32>} : memref<32x2xf32, #tpu.memory_space<vmem>>, vector<32x2xf32>,
    return
  }
  func.func @transform_0(%arg0: i32) -> (i32, i32) {
    %c0_i32 = arith.constant 0 : i32
    %c0_i32_0 = arith.constant 0 : i32
    return %arg0, %c0_i32 : i32, i32
  }
  func.func @transform_1(%arg0: i32) -> (i32, i32) {
    %c0_i32 = arith.constant 0 : i32
    %c0_i32_0 = arith.constant 0 : i32
    %c0_i32_1 = arith.constant 0 : i32
    return %c0_i32, %c0_i32_0 : i32, i32
  }
  func.func @transform_2(%arg0: i32) -> (i32, i32) {
    %c0_i32 = arith.constant 0 : i32
    %c0_i32_0 = arith.constant 0 : i32
    %c0_i32_1 = arith.constant 0 : i32
    return %c0_i32, %c0_i32_0 : i32, i32
  }
  func.func @transform_3(%arg0: i32) -> (i32, i32) {
    %c0_i32 = arith.constant 0 : i32
    %c0_i32_0 = arith.constant 0 : i32
    %c0_i32_1 = arith.constant 0 : i32
    return %c0_i32, %c0_i32_0 : i32, i32
  }
  func.func @transform_4(%arg0: i32) -> (i32, i32) {
    %c0_i32 = arith.constant 0 : i32
    %c0_i32_0 = arith.constant 0 : i32
    %c0_i32_1 = arith.constant 0 : i32
    return %c0_i32, %c0_i32_0 : i32, i32
  }
  func.func @transform_5(%arg0: i32) -> (i32, i32) {
    %c0_i32 = arith.constant 0 : i32
    %c0_i32_0 = arith.constant 0 : i32
    return %arg0, %c0_i32 : i32, i32
  }
}

</mosaic_0001>

<bundles_post_ra>
// kernel: tpu_custom_call.1
= control target key start
LH: loop header
LB: loop body
LE: loop exit
PB: predicated region body
PF: predicated region fallthrough
CT: control target
= control target key end

     0   :  { %vm66_vm0 = vcmask 392192   ;;  %vm122_vm1 = vcmask 15360   ;;  %s321_s1 = inlined_call_operand.vmem [shape: bf16[48,2], index: 1, kind: input, shape index: {}]   ;;  %s322_s0 = inlined_call_operand.vmem [shape: bf16[32,48], index: 0, kind: input, shape index: {}]   ;;  %s323_s2 = inlined_call_operand.vmem [shape: f32[1,2], index: 2, kind: input, shape index: {}]   ;;  %s324_s3 = inlined_call_operand.vmem [shape: f32[1,2], index: 3, kind: input, shape index: {}]   ;;  %s325_s4 = inlined_call_operand.vmem [shape: f32[1,2], index: 4, kind: input, shape index: {}]   ;;  %s326_s5 = inlined_call_operand.vmem [shape: f32[32,2], index: 5, kind: output, shape index: {}]  }
   0x1   :  { %v230_v0 = vld [vmem:[%s321_s1] sm:$0xff]   ;;  %v231_v1 = vld [vmem:[%s321_s1 + $0x8] sm:$0xff]   ;;  %v232_v3 = vld [vmem:[%s321_s1 + $0x10] sm:$0xff]  }
   0x2   :  { %220 = vmatprep.subr.bf16.mxu0 %v230_v0  ;;  %v233_v2 = vld [vmem:[%s322_s0] sm:$0xff]   ;;  %v234_v4 = vld [vmem:[%s322_s0 + $0x8] sm:$0xff]  }
   0x3   :  { %221 = vmatpush3.bf16.msra.mxu0 %v230_v0  ;;  %226 = vmatprep.mubr.msk.bf16.mxu0 %vm66_vm0, %v233_v2  ;;  %v205_v5 = vld [vmem:[%s323_s2] ss:$0 sm:$0xff] }
   0x4   :  { %222 = vmatprep.subr.bf16.mxu0 %v231_v1  ;;  %v213_v51 = vld [vmem:[%s324_s3] ss:$0 sm:$0xff] }
   0x5   :  { %v214_v53 = vld [vmem:[%s325_s4] ss:$0 sm:$0xff] }
   0x7   :  { %223 = vmatpush3.bf16.msra.mxu0 %v231_v1 }
   0x8   :  { %224 = vmatprep.subr.bf16.mxu0 %v232_v3 }
   0xb   :  { %225 = vmatpush3.bf16.msra.mxu0 %v232_v3 }
   0xe   :  { %227 = vmatmul.mubr.msk.bf16.vlgmr.msra.gmra.mrb[0].mxu0 %vm66_vm0, %v234_v4 }
  0xe1   :  { %v228_v6 = vpop.f32.mrb[0].mxu0 }
  0xe2   :  { %v116_v7 = vadd.f32 %v228_v6, %v205_v5  ;;  %v107_v8 = vpop.f32.mrb[1].mxu0 }
  0xe3   :  { %v108_v9 = vadd.f32 %v205_v5, %v107_v8  ;;  %v229_v10 = vpop.f32.mrb[2].mxu0 }
  0xe4   :  { %v119_v11 = vadd.f32 %v229_v10, %v205_v5  ;;  %v110_v12 = vpop.f32.mrb[3].mxu0  ;;  %v129_v13 = vsel %vm122_vm1, %v116_v7, 0.0 }
  0xe5   :  { %v111_v14 = vadd.f32 %v205_v5, %v110_v12  ;;  %130 = vadd.xlane.f32.xlu1 %v129_v13  ;;  %v123_v15 = vsel %vm122_vm1, %v108_v9, 0.0 }
  0xe6   :  { %124 = vadd.xlane.f32.xlu0 %v123_v15  ;;  %v132_v16 = vsel %vm122_vm1, %v119_v11, 0.0 }
  0xe7   :  { %v126_v17 = vsel %vm122_vm1, %v111_v14, 0.0 }
  0xe9   :  { %133 = vadd.xlane.f32.xlu1 %v132_v16 }
  0xea   :  { %127 = vadd.xlane.f32.xlu0 %v126_v17 }
 0x172   :  { %v131_v18 = vpop.xlane.xlu1 %130 }
 0x173   :  { %v137_v19 = vmul.f32 0.5, %v131_v18  ;;  %v125_v20 = vpop.xlane.xlu0 %124 }
 0x174   :  { %v135_v21 = vmul.f32 0.5, %v125_v20 }
 0x175   :  { %v141_v22 = vsub.f32 %v116_v7, %v137_v19 }
 0x176   :  { %v139_v23 = vsub.f32 %v108_v9, %v135_v21  ;;  %v134_v24 = vpop.xlane.xlu1 %133 }
 0x177   :  { %v138_v25 = vmul.f32 0.5, %v134_v24  ;;  %v128_v26 = vpop.xlane.xlu0 %127  ;;  %v145_v32 = vmul.f32 %v141_v22, %v141_v22 }
 0x178   :  { %v136_v27 = vmul.f32 0.5, %v128_v26  ;;  %v143_v28 = vmul.f32 %v139_v23, %v139_v23 }
 0x179   :  { %v142_v29 = vsub.f32 %v119_v11, %v138_v25  ;;  %v153_v34 = vsel %vm122_vm1, %v145_v32, 0.0 }
 0x17a   :  { %v140_v30 = vsub.f32 %v111_v14, %v136_v27  ;;  %v147_v31 = vsel %vm122_vm1, %v143_v28, 0.0 }
 0x17b   :  { %148 = vadd.xlane.f32.xlu0 %v147_v31  ;;  %v146_v36 = vmul.f32 %v142_v29, %v142_v29 }
 0x17c   :  { %v144_v33 = vmul.f32 %v140_v30, %v140_v30 }
 0x17d   :  { %v156_v37 = vsel %vm122_vm1, %v146_v36, 0.0 }
 0x17e   :  { %v150_v35 = vsel %vm122_vm1, %v144_v33, 0.0 }
 0x17f   :  { %154 = vadd.xlane.f32.xlu0 %v153_v34  ;;  %151 = vadd.xlane.f32.xlu1 %v150_v35 }
 0x183   :  { %157 = vadd.xlane.f32.xlu1 %v156_v37 }
 0x208   :  { %v149_v38 = vpop.xlane.xlu0 %148 }
 0x209   :  { %v159_v39 = vmul.f32 0.5, %v149_v38 }
 0x20b   :  { %v163_v40 = vadd.f32 1e-06, %v159_v39 }
 0x20c   :  { %v152_v41 = vpop.xlane.xlu1 %151  ;;  %v155_v42 = vpop.xlane.xlu0 %154 }
 0x20d   :  { %235 = vrsqrt.f32 %v163_v40  ;;  %v160_v43 = vmul.f32 0.5, %v152_v41  ;;  %v161_v44 = vmul.f32 0.5, %v155_v42 }
 0x20f   :  { %v164_v45 = vadd.f32 1e-06, %v160_v43  ;;  %v165_v46 = vadd.f32 1e-06, %v161_v44 }
 0x210   :  { %v158_v47 = vpop.xlane.xlu1 %157 }
 0x211   :  { %237 = vrsqrt.f32 %v164_v45  ;;  %v162_v48 = vmul.f32 0.5, %v158_v47 }
 0x212   :  { %239 = vrsqrt.f32 %v165_v46 }
 0x213   :  { %v166_v49 = vadd.f32 1e-06, %v162_v48 }
 0x215   :  { %241 = vrsqrt.f32 %v166_v49 }
 0x217   :  { %v236_v50 = vpop.eup %235 }
 0x218   :  { %v171_v52 = vmul.f32 %v236_v50, %v139_v23 }
 0x21a   :  { %v182_v54 = vmul.f32 %v213_v51, %v171_v52 }
 0x21b   :  { %v238_v55 = vpop.eup %237 }
 0x21c   :  { %v240_v56 = vpop.eup %239  ;;  %v193_v57 = vadd.f32 %v214_v53, %v182_v54  ;;  %v172_v58 = vmul.f32 %v238_v55, %v140_v30 }
 0x21d   :  { %v173_v59 = vmul.f32 %v240_v56, %v141_v22 }
 0x21e   :  { %197 = vst.msk [vmem:[%s326_s5] sm:$0xff] %vm122_vm1, %v193_v57  ;;  %v183_v60 = vmul.f32 %v213_v51, %v172_v58 }
 0x21f   :  { %v242_v61 = vpop.eup %241  ;;  %v184_v62 = vmul.f32 %v213_v51, %v173_v59 }
 0x220   :  { %v194_v63 = vadd.f32 %v214_v53, %v183_v60  ;;  %v174_v0 = vmul.f32 %v242_v61, %v142_v29 }
 0x221   :  { %v195_v1 = vadd.f32 %v214_v53, %v184_v62 }
 0x222   :  { %198 = vst.msk [vmem:[%s326_s5 + $0x8] sm:$0xff] %vm122_vm1, %v194_v63  ;;  %v185_v2 = vmul.f32 %v213_v51, %v174_v0 }
 0x223   :  { %199 = vst.msk [vmem:[%s326_s5 + $0x10] sm:$0xff] %vm122_vm1, %v195_v1 }
 0x224   :  { %v196_v3 = vadd.f32 %v214_v53, %v185_v2 }
 0x226   :  { %200 = vst.msk [vmem:[%s326_s5 + $0x18] sm:$0xff] %vm122_vm1, %v196_v3 }

</bundles_post_ra>
